<compile_context>
chip_gen: v5e
topology: v5e:2x2
jax: 0.10.0
libtpu: 0.0.40
codegen_flags: <defaults>
</compile_context>

<pallas_src>
import jax
import jax.numpy as jnp
from jax.experimental import pallas as pl
from jax.experimental.pallas import tpu as pltpu

BN_EPS = 1e-5
LANE = 128
N_CLASSES = 41


def _round_up(n, m):
    return ((n + m - 1) // m) * m


# --------------------------------------------------------------------------
# Kernel
# --------------------------------------------------------------------------
def libriphone_kernel(x_ref, w1_ref, b1_ref, w2_ref, b2_ref, w3_ref, b3_ref,
                      out_ref):
    # Linear(D, 128) with BatchNorm1d folded in; f32 accumulation on the MXU.
    h1 = jnp.dot(x_ref[...], w1_ref[...],
                 preferred_element_type=jnp.float32) + b1_ref[...]
    # Dropout(p=0.2) is identity at inference; ReLU on the f32 accumulator.
    h1 = jnp.maximum(h1, 0.0)

    # Linear(128, 64) + ReLU (hidden padded 64->128; padded cols are zero, and
    # ReLU(0) = 0, so the padding stays inert).
    h2 = jnp.dot(h1.astype(w2_ref.dtype), w2_ref[...],
                 preferred_element_type=jnp.float32) + b2_ref[...]
    h2 = jnp.maximum(h2, 0.0)

    # Linear(64, 41) — output lane-padded to 128; padded w3 rows/cols are zero.
    out_ref[...] = jnp.dot(h2.astype(w3_ref.dtype), w3_ref[...],
                           preferred_element_type=jnp.float32) + b3_ref[...]


# --------------------------------------------------------------------------
# Param prep (done once, outside the kernel): BN fold, lane padding, bf16 cast
# --------------------------------------------------------------------------
def prepare_params(params, compute_dtype=jnp.bfloat16):
    (w1, b1, gamma, beta, mean, var, w2, b2, w3, b3) = params
    # Fold BatchNorm1d (running stats, affine) into the first Linear.
    scale = gamma * jax.lax.rsqrt(var + BN_EPS)          # (1, 128)
    w1f = w1 * scale                                     # scale output columns
    b1f = (b1 - mean) * scale + beta

    # Pad input feature dim to a multiple of 128 (lane/MXU alignment).
    d_in = w1f.shape[0]
    d_pad = _round_up(d_in, LANE)
    if d_pad != d_in:
        w1f = jnp.pad(w1f, ((0, d_pad - d_in), (0, 0)))

    # Pad hidden feature dim 64 -> 128 (lane-dense h2, full MXU tiles).
    h_in = w2.shape[1]
    h_pad = _round_up(h_in, LANE)
    if h_pad != h_in:
        w2 = jnp.pad(w2, ((0, 0), (0, h_pad - h_in)))
        b2 = jnp.pad(b2, ((0, 0), (0, h_pad - h_in)))
        w3 = jnp.pad(w3, ((0, h_pad - h_in), (0, 0)))

    # Pad output feature dim 41 -> 128 for lane-dense, unmasked stores.
    n_out = w3.shape[1]
    n_pad = _round_up(n_out, LANE)
    if n_pad != n_out:
        w3 = jnp.pad(w3, ((0, 0), (0, n_pad - n_out)))
        b3 = jnp.pad(b3, ((0, 0), (0, n_pad - n_out)))

    return (w1f.astype(compute_dtype), b1f.astype(jnp.float32),
            w2.astype(compute_dtype), b2.astype(jnp.float32),
            w3.astype(compute_dtype), b3.astype(jnp.float32))


# --------------------------------------------------------------------------
# Forward wrapper: batch-tiled grid, resident weights, padded/sliced edges
# --------------------------------------------------------------------------
def libriphone_forward(x, prepared, *, tile_b=1024):
    (w1, b1, w2, b2, w3, b3) = prepared
    assert tile_b % 8 == 0, "tile_b must be a multiple of 8 (sublane)"
    B, d_in = x.shape
    d_pad = w1.shape[0]
    n_pad = w3.shape[1]

    # Clamp the tile to the (sublane-rounded) batch, then pad B to a full grid.
    tile_b = min(tile_b, _round_up(B, 8))
    b_pad = _round_up(B, tile_b)

    xp = x.astype(w1.dtype)
    if (b_pad, d_pad) != (B, d_in):
        xp = jnp.pad(xp, ((0, b_pad - B), (0, d_pad - d_in)))

    const = lambda i: (0, 0)  # weights/biases: same block every grid step
    out = pl.pallas_call(
        libriphone_kernel,
        out_shape=jax.ShapeDtypeStruct((b_pad, n_pad), jnp.float32),
        grid=(b_pad // tile_b,),
        in_specs=[
            pl.BlockSpec((tile_b, d_pad), lambda i: (i, 0)),  # x: batch-tiled
            pl.BlockSpec(w1.shape, const),                    # resident weights
            pl.BlockSpec(b1.shape, const),
            pl.BlockSpec(w2.shape, const),
            pl.BlockSpec(b2.shape, const),
            pl.BlockSpec(w3.shape, const),
            pl.BlockSpec(b3.shape, const),
        ],
        out_specs=pl.BlockSpec((tile_b, n_pad), lambda i: (i, 0)),
        compiler_params=pltpu.CompilerParams(
            dimension_semantics=("parallel",)),
    )(xp, w1, b1, w2, b2, w3, b3)
    return out[:B, :N_CLASSES]


# --------------------------------------------------------------------------
# Init + references
# --------------------------------------------------------------------------
def init_params(key, input_dim):
    ks = jax.random.split(key, 8)

    def lin(kw, kb, fan_in, fan_out):
        bound = 1.0 / (fan_in ** 0.5)
        w = jax.random.uniform(kw, (fan_in, fan_out), jnp.float32, -bound, bound)
        b = jax.random.uniform(kb, (1, fan_out), jnp.float32, -bound, bound)
        return w, b

    w1, b1 = lin(ks[0], ks[1], input_dim, 128)
    w2, b2 = lin(ks[2], ks[3], 128, 64)
    w3, b3 = lin(ks[4], ks[5], 64, N_CLASSES)
    gamma = jnp.ones((1, 128), jnp.float32)
    beta = jnp.zeros((1, 128), jnp.float32)
    # Non-trivial running stats so the BN fold is actually exercised.
    mean = 0.1 * jax.random.normal(ks[6], (1, 128), jnp.float32)
    var = jnp.abs(1.0 + 0.1 * jax.random.normal(ks[7], (1, 128), jnp.float32))
    return (w1, b1, gamma, beta, mean, var, w2, b2, w3, b3)


def reference_forward_f32(x, params):
    """Original module semantics in f32 (BN running stats, dropout identity)."""
    (w1, b1, gamma, beta, mean, var, w2, b2, w3, b3) = params
    h1 = x @ w1 + b1
    h1 = (h1 - mean) * jax.lax.rsqrt(var + BN_EPS) * gamma + beta
    h1 = jnp.maximum(h1, 0.0)
    h2 = jnp.maximum(h1 @ w2 + b2, 0.0)
    return h2 @ w3 + b3


def reference_forward_prepared(x, prepared):
    """Pure-JAX replica of the kernel math (same folded/padded bf16 operands)."""
    (w1, b1, w2, b2, w3, b3) = prepared
    d_pad = w1.shape[0]
    xp = jnp.pad(x.astype(w1.dtype), ((0, 0), (0, d_pad - x.shape[1])))
    h1 = jnp.maximum(
        jnp.dot(xp, w1, preferred_element_type=jnp.float32) + b1, 0.0)
    h2 = jnp.maximum(
        jnp.dot(h1.astype(w2.dtype), w2,
                preferred_element_type=jnp.float32) + b2, 0.0)
    out = jnp.dot(h2.astype(w3.dtype), w3,
                  preferred_element_type=jnp.float32) + b3
    return out[:, :N_CLASSES]


if __name__ == "__main__":
    key = jax.random.PRNGKey(0)
    k_x, k_p = jax.random.split(key)

    # Small, deliberately unaligned shapes: B=200 (pads to 4 grid steps of 64),
    # D=100 (pads to 128), hidden 64 (pads to 128), output 41 (pads to 128).
    B, D = 200, 100
    x = jax.random.normal(k_x, (B, D), jnp.float32)
    raw_params = init_params(k_p, D)
    prepared = prepare_params(raw_params, compute_dtype=jnp.bfloat16)

    out = libriphone_forward(x, prepared, tile_b=64)
    out = jax.block_until_ready(out)
    assert out.shape == (B, N_CLASSES)

    # Tight check against a pure-JAX replica of the exact kernel math.
    ref_bf16 = reference_forward_prepared(x, prepared)
    assert jnp.allclose(out, ref_bf16, atol=1e-3, rtol=1e-3)

    # Looser check against the original f32 module semantics (bf16 operands
    # introduce ~1e-2-level differences).
    ref_f32 = reference_forward_f32(x, raw_params)
    assert jnp.allclose(out, ref_f32, atol=5e-2, rtol=5e-2)

    print("KERNEL_OK")
</pallas_src>

<mosaic_0001>
module attributes {stable_mosaic.version = 11 : i64} {
  func.func @libriphone_kernel(%arg0: i32, %arg1: memref<64x128xbf16, #tpu.memory_space<vmem>>, %arg2: memref<128x128xbf16, #tpu.memory_space<vmem>>, %arg3: memref<1x128xf32, #tpu.memory_space<vmem>>, %arg4: memref<128x128xbf16, #tpu.memory_space<vmem>>, %arg5: memref<1x128xf32, #tpu.memory_space<vmem>>, %arg6: memref<128x128xbf16, #tpu.memory_space<vmem>>, %arg7: memref<1x128xf32, #tpu.memory_space<vmem>>, %arg8: memref<64x128xf32, #tpu.memory_space<vmem>>) attributes {dimension_semantics = [#tpu.dimension_semantics<parallel>], iteration_bounds = array<i64: 4>, scalar_prefetch = 0 : i64, scratch_operands = 0 : i64, tpu.core_type = #tpu.core_type<tc>, window_params = [{transform_indices = @transform_0, window_bounds = array<i64: 64, 128>}, {pipeline_mode = #tpu.pipeline_mode<synchronous>, transform_indices = @transform_1, window_bounds = array<i64: 128, 128>}, {pipeline_mode = #tpu.pipeline_mode<synchronous>, transform_indices = @transform_2, window_bounds = array<i64: 1, 128>}, {pipeline_mode = #tpu.pipeline_mode<synchronous>, transform_indices = @transform_3, window_bounds = array<i64: 128, 128>}, {pipeline_mode = #tpu.pipeline_mode<synchronous>, transform_indices = @transform_4, window_bounds = array<i64: 1, 128>}, {pipeline_mode = #tpu.pipeline_mode<synchronous>, transform_indices = @transform_5, window_bounds = array<i64: 128, 128>}, {pipeline_mode = #tpu.pipeline_mode<synchronous>, transform_indices = @transform_6, window_bounds = array<i64: 1, 128>}, {transform_indices = @transform_7, window_bounds = array<i64: 64, 128>}]} {
    %c0 = arith.constant 0 : index
    %c0_0 = arith.constant 0 : index
    %0 = vector.load %arg1[%c0, %c0_0] : memref<64x128xbf16, #tpu.memory_space<vmem>>, vector<64x128xbf16>
    %c0_1 = arith.constant 0 : index
    %c0_2 = arith.constant 0 : index
    %1 = vector.load %arg2[%c0_1, %c0_2] : memref<128x128xbf16, #tpu.memory_space<vmem>>, vector<128x128xbf16>
    %cst = arith.constant dense<0.000000e+00> : vector<64x128xf32>
    %2 = tpu.matmul %0, %1, %cst {dimension_numbers = #tpu.dot_dimension_numbers<[1], [0], [0], [1], [0, 0, 1, 1], [], []>} : vector<64x128xbf16>, vector<128x128xbf16>, vector<64x128xf32> -> vector<64x128xf32>
    %c0_3 = arith.constant 0 : index
    %c0_4 = arith.constant 0 : index
    %3 = vector.load %arg3[%c0_3, %c0_4] : memref<1x128xf32, #tpu.memory_space<vmem>>, vector<1x128xf32>
    %4 = vector.broadcast %3 : vector<1x128xf32> to vector<64x128xf32>
    %5 = arith.addf %2, %4 : vector<64x128xf32>
    %cst_5 = arith.constant 0.000000e+00 : f32
    %6 = vector.broadcast %cst_5 : f32 to vector<64x128xf32>
    %7 = arith.maximumf %5, %6 : vector<64x128xf32>
    %8 = arith.truncf %7 : vector<64x128xf32> to vector<64x128xbf16>
    %c0_6 = arith.constant 0 : index
    %c0_7 = arith.constant 0 : index
    %9 = vector.load %arg4[%c0_6, %c0_7] : memref<128x128xbf16, #tpu.memory_space<vmem>>, vector<128x128xbf16>
    %cst_8 = arith.constant dense<0.000000e+00> : vector<64x128xf32>
    %10 = tpu.matmul %8, %9, %cst_8 {dimension_numbers = #tpu.dot_dimension_numbers<[1], [0], [0], [1], [0, 0, 1, 1], [], []>} : vector<64x128xbf16>, vector<128x128xbf16>, vector<64x128xf32> -> vector<64x128xf32>
    %c0_9 = arith.constant 0 : index
    %c0_10 = arith.constant 0 : index
    %11 = vector.load %arg5[%c0_9, %c0_10] : memref<1x128xf32, #tpu.memory_space<vmem>>, vector<1x128xf32>
    %12 = vector.broadcast %11 : vector<1x128xf32> to vector<64x128xf32>
    %13 = arith.addf %10, %12 : vector<64x128xf32>
    %cst_11 = arith.constant 0.000000e+00 : f32
    %14 = vector.broadcast %cst_11 : f32 to vector<64x128xf32>
    %15 = arith.maximumf %13, %14 : vector<64x128xf32>
    %16 = arith.truncf %15 : vector<64x128xf32> to vector<64x128xbf16>
    %c0_12 = arith.constant 0 : index
    %c0_13 = arith.constant 0 : index
    %17 = vector.load %arg6[%c0_12, %c0_13] : memref<128x128xbf16, #tpu.memory_space<vmem>>, vector<128x128xbf16>
    %cst_14 = arith.constant dense<0.000000e+00> : vector<64x128xf32>
    %18 = tpu.matmul %16, %17, %cst_14 {dimension_numbers = #tpu.dot_dimension_numbers<[1], [0], [0], [1], [0, 0, 1, 1], [], []>} : vector<64x128xbf16>, vector<128x128xbf16>, vector<64x128xf32> -> vector<64x128xf32>
    %c0_15 = arith.constant 0 : index
    %c0_16 = arith.constant 0 : index
    %19 = vector.load %arg7[%c0_15, %c0_16] : memref<1x128xf32, #tpu.memory_space<vmem>>, vector<1x128xf32>
    %20 = vector.broadcast %19 : vector<1x128xf32> to vector<64x128xf32>
    %21 = arith.addf %18, %20 : vector<64x128xf32>
    %c0_17 = arith.constant 0 : index
    %c0_18 = arith.constant 0 : index
    %22 = vector.load %arg8[%c0_17, %c0_18] : memref<64x128xf32, #tpu.memory_space<vmem>>, vector<64x128xf32>
    tpu.vector_store %arg8[%c0_17, %c0_18], %21 {strides = array<i32>} : memref<64x128xf32, #tpu.memory_space<vmem>>, vector<64x128xf32>,
    return
  }
  func.func @transform_0(%arg0: i32) -> (i32, i32) {
    %c0_i32 = arith.constant 0 : i32
    %c0_i32_0 = arith.constant 0 : i32
    return %arg0, %c0_i32 : i32, i32
  }
  func.func @transform_1(%arg0: i32) -> (i32, i32) {
    %c0_i32 = arith.constant 0 : i32
    %c0_i32_0 = arith.constant 0 : i32
    %c0_i32_1 = arith.constant 0 : i32
    return %c0_i32, %c0_i32_0 : i32, i32
  }
  func.func @transform_2(%arg0: i32) -> (i32, i32) {
    %c0_i32 = arith.constant 0 : i32
    %c0_i32_0 = arith.constant 0 : i32
    %c0_i32_1 = arith.constant 0 : i32
    return %c0_i32, %c0_i32_0 : i32, i32
  }
  func.func @transform_3(%arg0: i32) -> (i32, i32) {
    %c0_i32 = arith.constant 0 : i32
    %c0_i32_0 = arith.constant 0 : i32
    %c0_i32_1 = arith.constant 0 : i32
    return %c0_i32, %c0_i32_0 : i32, i32
  }
  func.func @transform_4(%arg0: i32) -> (i32, i32) {
    %c0_i32 = arith.constant 0 : i32
    %c0_i32_0 = arith.constant 0 : i32
    %c0_i32_1 = arith.constant 0 : i32
    return %c0_i32, %c0_i32_0 : i32, i32
  }
  func.func @transform_5(%arg0: i32) -> (i32, i32) {
    %c0_i32 = arith.constant 0 : i32
    %c0_i32_0 = arith.constant 0 : i32
    %c0_i32_1 = arith.constant 0 : i32
    return %c0_i32, %c0_i32_0 : i32, i32
  }
  func.func @transform_6(%arg0: i32) -> (i32, i32) {
    %c0_i32 = arith.constant 0 : i32
    %c0_i32_0 = arith.constant 0 : i32
    %c0_i32_1 = arith.constant 0 : i32
    return %c0_i32, %c0_i32_0 : i32, i32
  }
  func.func @transform_7(%arg0: i32) -> (i32, i32) {
    %c0_i32 = arith.constant 0 : i32
    %c0_i32_0 = arith.constant 0 : i32
    return %arg0, %c0_i32 : i32, i32
  }
}

</mosaic_0001>

<bundles_post_ra>
// kernel: tpu_custom_call.1
= control target key start
LH: loop header
LB: loop body
LE: loop exit
PB: predicated region body
PF: predicated region fallthrough
CT: control target
= control target key end

     0   :  { %s1505_s0 = inlined_call_operand.hbm [shape: bf16[256,128], index: 0, kind: input, shape index: {}]   ;;  %s1506_s1 = inlined_call_operand.hbm [shape: bf16[128,128], index: 1, kind: input, shape index: {}]   ;;  %s1507_s2 = inlined_call_operand.vmem [shape: f32[1,128], index: 2, kind: input, shape index: {}]   ;;  %s1508_s3 = inlined_call_operand.hbm [shape: bf16[128,128], index: 3, kind: input, shape index: {}]   ;;  %s1509_s4 = inlined_call_operand.vmem [shape: f32[1,128], index: 4, kind: input, shape index: {}]   ;;  %s1510_s5 = inlined_call_operand.hbm [shape: bf16[128,128], index: 5, kind: input, shape index: {}]   ;;  %s1511_s6 = inlined_call_operand.vmem [shape: f32[1,128], index: 6, kind: input, shape index: {}]   ;;  %s1512_s7 = inlined_call_operand.hbm [shape: f32[256,128], index: 7, kind: output, shape index: {}]  }
   0x1   :  { %1515 = sst [smem:[#allocation15_spill]] %s1506_s1 }
   0x2   :  { %12 = vsyncpa [#allocation3], 0 }
   0x3   :  { %14 = vsyncpa [#allocation3 + $0x1], 0 }
   0x4   :  { %15 = vsyncpa [#allocation6], 0 }
   0x5   :  { %16 = vsyncpa [#allocation9], 0 }
   0x6   :  { %17 = vsyncpa [#allocation4], 0 }
   0x7   :  { %19 = vsyncpa [#allocation4 + $0x1], 0  ;;  %s1321_s24 = smov 0   ;;  %s1323_s25 = smov 0  }
   0x8   :  { %s1325_s26 = smov 0   ;;  %s1327_s27 = smov 0  }
   0x9 LB: > { %s1342_s28 = sadd.s32 4294967295, %s1272_s27   ;;  %s824_s29 = sadd.s32 4294967294, %s1272_s27   ;;  %s1272_s27 = sphi %s1327_s27, %s1528_s27   ;;  %s1268_s26 = sphi %s1325_s26, %s1527_s26   ;;  %s1264_s25 = sphi %s1323_s25, %s1526_s25   ;;  %s1260_s24 = sphi %s1321_s24, %s1525_s24  }
   0xa   : > { %p45_p0 = scmp.ne.s32.totalorder %s1264_s25, %s1260_s24  ;;  %p46_p1 = scmp.eq.s32.totalorder %s1342_s28, 0 }
   0xb   : > { %p195_p2 = scmp.eq.s32.totalorder %s1342_s28, 3  ;;  %p201_p3 = scmp.eq.s32.totalorder %s824_s29, 3 }
   0xc   : > { %p1351_p4 = por %p46_p1, %p45_p0  ;;  %p825_p5 = scmp.ge.s32.totalorder %s1272_s27, 1 }
   0xd   : > { %p1356_p6 = por %p201_p3, %p45_p0  ;;  %p208_p7 = scmp.lt.s32.totalorder %s1272_s27, 5 }
   0xe   : > { %s1518_s1 = sld [smem:[#allocation15_spill]]  ;;  %s1274_s13 = smov [#allocation5]  }
   0xf   : > { %p1364_p8 = pnand %p825_p5, %p208_p7  ;;  %s221_s14 = sshll.u32 %s1274_s13, 4  ;;  %s222_s14 = int_to_ptr.vmem [resolvable:$true] %s221_s14 }
  0x10   : > { %s236_s18 = sshll.u32 %s1508_s3, 4  ;;  %s1513_s19 = smov 64   ;;  %s237_s18 = int_to_ptr.hbm [resolvable:$true] %s236_s18 }
  0x11   : > { %p1010_p9 = pneg %p1364_p8  ;;  %s1514_s20 = smov 4  }
  0x12   : > { %s1277_s21 = smov [#allocation7]   ;;  %s253_s9 = sshll.u32 %s1510_s5, 4  ;;  %s254_s9 = int_to_ptr.hbm [resolvable:$true] %s253_s9 }
  0x13   : > { %p1372_p10 = pnand %p1010_p9, %p46_p1  ;;  %s238_s22 = sshll.u32 %s1277_s21, 4  ;;  %s239_s22 = int_to_ptr.vmem [resolvable:$true] %s238_s22 }
  0x14   : > { %s219_s11 = sshll.u32 %s1518_s1, 4  ;;  %s1278_s10 = smov [#allocation8]   ;;  %s220_s11 = int_to_ptr.hbm [resolvable:$true] %s219_s11 }
  0x15   : > { %1013 = dma.hbm_to_vmem [thread:$0]  (!%p1372_p10), %s220_s11, 1024, %s222_s14, [#allocation6], %s1513_s19, %s1513_s19, %s1514_s20  }
  0x16   : > { %1016 = dma.hbm_to_vmem [thread:$0]  (!%p1372_p10), %s237_s18, 1024, %s239_s22, [#allocation6], %s1513_s19, %s1513_s19, %s1514_s20  }
  0x17   : > { %s255_s11 = sshll.u32 %s1278_s10, 4  ;;  %s1393_s13 = sadd.s32 1, %s1272_s27   ;;  %s256_s11 = int_to_ptr.vmem [resolvable:$true] %s255_s11 }
  0x18   : > { %1019 = dma.hbm_to_vmem [thread:$0]  (!%p1372_p10), %s254_s9, 1024, %s256_s11, [#allocation9], %s1513_s19, %s1513_s19, %s1514_s20  }
  0x19   : > { %s29_s14 = ssub.s32 %s1272_s27, %s1393_s13  ;;  %s32_s16 = sadd.s32 1, %s1268_s26 }
  0x1a   : > { %p30_p11 = scmp.eq.s32.totalorder %s29_s14, 0  ;;  %p39_p12 = scmp.ne.s32.totalorder %s1268_s26, %s1264_s25 }
  0x1b   : > { %p40_p13 = scmp.eq.s32.totalorder %s1272_s27, 0  ;;  %p1031_p3 = scmp.lt.s32.totalorder %s1272_s27, 4 }
  0x1c   : > { %s1407_s17 = scalar_select %p30_p11, %s1268_s26, %s32_s16  }
  0x1d   : > { %p1411_p0 = por %p195_p2, %p39_p12  ;;  %s272_s21 = sand.u32 1, %s1268_s26  }
  0x1e   : > { %s956_s15 = sshll.u32 %s1272_s27, 5  ;;  %p41_p5 = por %p40_p13, %p39_p12 }
  0x1f   : > { %s830_s22 = sshll.u32 %s272_s21, 5  ;;  %s281_s9 = scalar_lea.hbm %s1505_s0, %s956_s15 }
  0x20   : > { %s282_s10 = sshll.u32 %s281_s9, 4  ;;  %s276_s11 = scalar_lea.vmem [#allocation2], %s830_s22  ;;  %s283_s10 = int_to_ptr.hbm [resolvable:$true] %s282_s10 }
  0x21   : > { %s284_s14 = sshll.u32 %s276_s11, 4  ;;  %p1421_p7 = pnand %p1031_p3, %p41_p5  ;;  %s285_s14 = int_to_ptr.vmem [resolvable:$true] %s284_s14 }
  0x22   : > { %s273_s19 = scalar_lea.sflag [#allocation3], %s272_s21  ;;  %s1168_s20 = sshra.s32 %s283_s10, 4  ;;  %s1169_s20 = int_to_ptr.hbm [resolvable:$true] %s1168_s20 }
  0x23   : > { %s1170_s1 = scalar_lea.hbm %s1169_s20, 32  ;;  %p1172_p9 = pneg %p1421_p7 }
  0x24   : > { %p1171_p2 = scmp.ne.s32.totalorder %s1169_s20, %s1170_s1  ;;  %s1175_s22 = scalar_lea.hbm %s1505_s0, 128 }
  0x25   : > { %p1176_p12 = scmp.lt.s32.totalorder %s1169_s20, %s1505_s0  ;;  %p1177_p13 = scmp.lt.s32.totalorder %s1175_s22, %s1170_s1 }
  0x26   : > { %p1173_p10 = pnand %p1172_p9, %p1171_p2 }
  0x27   : > { %p1178_p3 = por %p1177_p13, %p1176_p12 }
  0x28   : > { %p1174_p11 = pneg %p1173_p10 }
  0x2a   : > { %p1179_p5 = pnand %p1178_p3, %p1174_p11 }
  0x2c   : > { %1182 = shalt.err (!%p1179_p5)
}
  0x2d   : > { %s1523_s21 = smov 4   ;;  %s1524_s11 = smov 64  }
  0x2e   : > { %1023 = dma.hbm_to_vmem [thread:$0]  (!%p1421_p7), %s283_s10, 512, %s285_s14, %s273_s19, %s1524_s11, %s1524_s11, %s1523_s21  }
  0x2f   : > { %296 = sbr.rel (%p1364_p8) target bundleno = 563 (0x233), region = 48  ;;  %s1441_s15 = sand.u32 (!%p1364_p8), 1, %s1264_s25  }
  0x30   : > { %s834_s20 = sshll.u32 (!%p1364_p8), %s1441_s15, 5  ;;  %s299_s1 = scalar_lea.sflag (!%p1364_p8), [#allocation3], %s1441_s15 }
  0x31   : > { %s1445_s23 = scalar_lea.vmem (!%p1364_p8), [#allocation2], %s834_s20 }
  0x34   : > { %1243 = dma.done.wait (%p1351_p4), %s299_s1, 512  }
  0x35   : > { %1245 = vsyncadd (%p1351_p4), %s299_s1, 4294966784 }
  0x36   : > { %1247 = dma.done.wait (%p46_p1), [#allocation6], 2048  }
  0x37   : > { %1249 = vsyncadd (%p46_p1), [#allocation6], 4294965248 }
  0x38   : > { %1251 = dma.done.wait (%p46_p1), [#allocation9], 1024  }
  0x39   : > { %1253 = vsyncadd (%p46_p1), [#allocation9], 4294966272  ;;  %v968_v0 = vld [vmem:[#allocation5 + $0x38] sm:$0xff]  ;;  %v967_v1 = vld [vmem:[#allocation5 + $0x30] sm:$0xff]  ;;  %s838_s14 = sshll.u32 %s1441_s15, 6  ;;  %s985_s9 = sshll.u32 %s1342_s28, 6 }
  0x3a   : > { %451 = vmatpush.bf16.msra.mxu0 %v968_v0  ;;  %986 = vmatpush.bf16.msra.mxu3 %v968_v0  ;;  %v966_v2 = vld [vmem:[#allocation5 + $0x28] sm:$0xff]  ;;  %v965_v3 = vld [vmem:[#allocation5 + $0x20] sm:$0xff]  ;;  %v964_v4 = vld [vmem:[#allocation5 + $0x18] sm:$0xff]  ;;  %s348_s29 = scalar_lea.vmem [#allocation10], %s838_s14  ;;  %s718_s20 = scalar_lea.hbm %s1512_s7, %s985_s9 }
  0x3b   : > { %v963_v5 = vld [vmem:[#allocation5 + $0x10] sm:$0xff]  ;;  %v962_v6 = vld [vmem:[#allocation5 + $0x8] sm:$0xff]  ;;  %v961_v7 = vld [vmem:[#allocation5] sm:$0xff]  ;;  %s719_s1 = sshll.u32 %s348_s29, 4  ;;  %s707_s30 = scalar_lea.sflag [#allocation4], %s1441_s15  ;;  %s720_s1 = int_to_ptr.vmem [resolvable:$true] %s719_s1 }
  0x3c   : > { %v957_v8 = vld [vmem:[%s1445_s23] sm:$0xff]  ;;  %v958_v9 = vld [vmem:[%s1445_s23 + $0x8] sm:$0xff]  ;;  %v976_v10 = vld [vmem:[#allocation7 + $0x38] sm:$0xff]  ;;  %s1218_s14 = scalar_lea.hbm %s1512_s7, 256 }
  0x3d   : > { %560 = vmatpush.bf16.msra.mxu1 %v976_v10  ;;  %v975_v11 = vld [vmem:[#allocation7 + $0x30] sm:$0xff]  ;;  %v974_v12 = vld [vmem:[#allocation7 + $0x28] sm:$0xff]  ;;  %v973_v13 = vld [vmem:[#allocation7 + $0x20] sm:$0xff] }
  0x3e   : > { %452 = vmatpush.bf16.msra.mxu0 %v967_v1  ;;  %987 = vmatpush.bf16.msra.mxu3 %v967_v1  ;;  %v959_v14 = vld [vmem:[%s1445_s23 + $0x10] sm:$0xff]  ;;  %v960_v15 = vld [vmem:[%s1445_s23 + $0x18] sm:$0xff]  ;;  %v970_v18 = vld [vmem:[#allocation7 + $0x8] sm:$0xff]  ;;  %s721_s23 = sshll.u32 %s718_s20, 4  ;;  %s722_s23 = int_to_ptr.hbm [resolvable:$true] %s721_s23 }
  0x3f   : > { %v972_v16 = vld [vmem:[#allocation7 + $0x18] sm:$0xff]  ;;  %v971_v17 = vld [vmem:[#allocation7 + $0x10] sm:$0xff]  ;;  %v969_v19 = vld [vmem:[#allocation7] sm:$0xff]  ;;  %s1212_s12 = sshra.s32 %s722_s23, 4  ;;  %s1213_s12 = int_to_ptr.hbm [resolvable:$true] %s1212_s12 }
  0x40   : > { %v1075_v21 = vld [vmem:[%s1507_s2] ss:$0 sm:$0xff]  ;;  %v984_v37 = vld [vmem:[#allocation8 + $0x38] sm:$0xff]  ;;  %v983_v38 = vld [vmem:[#allocation8 + $0x30] sm:$0xff]  ;;  %s1214_s19 = scalar_lea.hbm %s1213_s12, 64  ;;  %p1219_p7 = scmp.lt.s32.totalorder %s1213_s12, %s1512_s7 }
  0x41   : > { %561 = vmatpush.bf16.msra.mxu1 %v975_v11  ;;  %669 = vmatpush.bf16.msra.mxu2 %v984_v37  ;;  %v982_v41 = vld [vmem:[#allocation8 + $0x28] sm:$0xff]  ;;  %v981_v45 = vld [vmem:[#allocation8 + $0x20] sm:$0xff]  ;;  %v980_v53 = vld [vmem:[#allocation8 + $0x18] sm:$0xff]  ;;  %p1215_p1 = scmp.ne.s32.totalorder %s1213_s12, %s1214_s19  ;;  %p1220_p2 = scmp.lt.s32.totalorder %s1218_s14, %s1214_s19 }
  0x42   : > { %453 = vmatpush.bf16.msra.mxu0 %v966_v2  ;;  %988 = vmatpush.bf16.msra.mxu3 %v966_v2  ;;  %v979_v54 = vld [vmem:[#allocation8 + $0x10] sm:$0xff]  ;;  %v978_v55 = vld [vmem:[#allocation8 + $0x8] sm:$0xff]  ;;  %v977_v56 = vld [vmem:[#allocation8] sm:$0xff] }
  0x43   : > { %v1076_v58 = vld [vmem:[%s1509_s4] ss:$0 sm:$0xff]  ;;  %p1216_p4 = pnand %p1215_p1, %p1411_p0  ;;  %p1221_p9 = por %p1220_p2, %p1219_p7 }
  0x45   : > { %562 = vmatpush.bf16.msra.mxu1 %v974_v12  ;;  %670 = vmatpush.bf16.msra.mxu2 %v983_v38  ;;  %p1217_p8 = pneg %p1216_p4 }
  0x46   : > { %454 = vmatpush.bf16.msra.mxu0 %v965_v3  ;;  %989 = vmatpush.bf16.msra.mxu3 %v965_v3 }
  0x47   : > { %p1222_p10 = pnand %p1221_p9, %p1217_p8 }
  0x49   : > { %563 = vmatpush.bf16.msra.mxu1 %v973_v13  ;;  %671 = vmatpush.bf16.msra.mxu2 %v982_v41 }
  0x4a   : > { %455 = vmatpush.bf16.msra.mxu0 %v964_v4  ;;  %990 = vmatpush.bf16.msra.mxu3 %v964_v4 }
  0x4d   : > { %564 = vmatpush.bf16.msra.mxu1 %v972_v16  ;;  %672 = vmatpush.bf16.msra.mxu2 %v981_v45 }
  0x4e   : > { %456 = vmatpush.bf16.msra.mxu0 %v963_v5  ;;  %991 = vmatpush.bf16.msra.mxu3 %v963_v5 }
  0x51   : > { %565 = vmatpush.bf16.msra.mxu1 %v971_v17  ;;  %673 = vmatpush.bf16.msra.mxu2 %v980_v53 }
  0x52   : > { %457 = vmatpush.bf16.msra.mxu0 %v962_v6  ;;  %992 = vmatpush.bf16.msra.mxu3 %v962_v6 }
  0x55   : > { %566 = vmatpush.bf16.msra.mxu1 %v970_v18  ;;  %674 = vmatpush.bf16.msra.mxu2 %v979_v54 }
  0x56   : > { %458 = vmatpush.bf16.msra.mxu0 %v961_v7  ;;  %993 = vmatpush.bf16.msra.mxu3 %v961_v7 }
  0x59   : > { %459 = vmatmul.bf16.vlgmr.msra.gmra.mxu0 %v957_v8  ;;  %464 = vmatmul.bf16.vlgmr.msra.gmra.mxu3 %v958_v9 }
  0x5a   : > { %567 = vmatpush.bf16.msra.mxu1 %v969_v19  ;;  %675 = vmatpush.bf16.msra.mxu2 %v978_v55 }
  0x5e   : > { %676 = vmatpush.bf16.msra.mxu2 %v977_v56 }
  0x69   : > { %469 = vmatmul.bf16.gmra.mxu3 %v959_v14 }
  0x79   : > { %474 = vmatmul.bf16.gmra.mxu3 %v960_v15 }
  0xd6   : > { %v460_v20 = vpop.f32.mrf.mxu0 }
  0xd7   : > { %v461_v23 = vadd.f32 %v1075_v21, %v460_v20 }
  0xd9   : > { %v480_v26 = vmax.f32 %v461_v23, 0.0 }
  0xdc   : > { %v465_v22 = vpop.f32.mrf.mxu3 }
  0xdd   : > { %v466_v30 = vadd.f32 %v1075_v21, %v465_v22  ;;  %v1077_v22 = vld [vmem:[%s1511_s6] ss:$0 sm:$0xff] }
  0xde   : > { %v462_v24 = vpop.f32.mrf.mxu0 }
  0xdf   : > { %v463_v25 = vadd.f32 %v1075_v21, %v462_v24  ;;  %v482_v33 = vmax.f32 %v466_v30, 0.0 }
  0xe1   : > { %v481_v27 = vmax.f32 %v463_v25, 0.0 }
  0xe3   : > { %v488_v28 = vpack.c.bf16 %v481_v27, %v480_v26 }
  0xe4   : > { %v467_v29 = vpop.f32.mrf.mxu3 }
  0xe5   : > { %568 = vmatmul.bf16.vlgmr.msra.gmra.mxu1 %v488_v28  ;;  %v468_v31 = vadd.f32 %v1075_v21, %v467_v29 }
  0xe7   : > { %v483_v34 = vmax.f32 %v468_v31, 0.0 }
  0xe9   : > { %v489_v35 = vpack.c.bf16 %v483_v34, %v482_v33 }
  0xec   : > { %v470_v32 = vpop.f32.mrf.mxu3 }
  0xed   : > { %v471_v39 = vadd.f32 %v1075_v21, %v470_v32 }
  0xef   : > { %v484_v43 = vmax.f32 %v471_v39, 0.0 }
  0xf4   : > { %v472_v36 = vpop.f32.mrf.mxu3 }
  0xf5   : > { %573 = vmatmul.bf16.gmra.mxu1 %v489_v35  ;;  %v473_v40 = vadd.f32 %v1075_v21, %v472_v36 }
  0xf7   : > { %v485_v44 = vmax.f32 %v473_v40, 0.0 }
  0xf9   : > { %v490_v46 = vpack.c.bf16 %v485_v44, %v484_v43 }
  0xfc   : > { %v475_v42 = vpop.f32.mrf.mxu3 }
  0xfd   : > { %v476_v48 = vadd.f32 %v1075_v21, %v475_v42 }
  0xff   : > { %v486_v50 = vmax.f32 %v476_v48, 0.0 }
 0x104   : > { %v477_v47 = vpop.f32.mrf.mxu3 }
 0x105   : > { %578 = vmatmul.bf16.gmra.mxu1 %v490_v46  ;;  %v478_v49 = vadd.f32 %v1075_v21, %v477_v47 }
 0x107   : > { %v487_v51 = vmax.f32 %v478_v49, 0.0 }
 0x109   : > { %v491_v52 = vpack.c.bf16 %v487_v51, %v486_v50 }
 0x115   : > { %583 = vmatmul.bf16.gmra.mxu1 %v491_v52 }
 0x162   : > { %v569_v57 = vpop.f32.mrf.mxu1 }
 0x163   : > { %v570_v59 = vadd.f32 %v1076_v58, %v569_v57 }
 0x165   : > { %v589_v62 = vmax.f32 %v570_v59, 0.0 }
 0x16a   : > { %v571_v60 = vpop.f32.mrf.mxu1 }
 0x16b   : > { %v572_v61 = vadd.f32 %v1076_v58, %v571_v60 }
 0x16d   : > { %v590_v63 = vmax.f32 %v572_v61, 0.0 }
 0x16f   : > { %v597_v0 = vpack.c.bf16 %v590_v63, %v589_v62 }
 0x171   : > { %677 = vmatmul.bf16.vlgmr.msra.gmra.mxu2 %v597_v0 }
 0x172   : > { %v574_v1 = vpop.f32.mrf.mxu1 }
 0x173   : > { %v575_v2 = vadd.f32 %v1076_v58, %v574_v1 }
 0x175   : > { %v591_v5 = vmax.f32 %v575_v2, 0.0 }
 0x17a   : > { %v576_v3 = vpop.f32.mrf.mxu1 }
 0x17b   : > { %v577_v4 = vadd.f32 %v1076_v58, %v576_v3 }
 0x17d   : > { %v592_v6 = vmax.f32 %v577_v4, 0.0 }
 0x17f   : > { %v598_v7 = vpack.c.bf16 %v592_v6, %v591_v5 }
 0x181   : > { %682 = vmatmul.bf16.gmra.mxu2 %v598_v7 }
 0x182   : > { %v579_v8 = vpop.f32.mrf.mxu1 }
 0x183   : > { %v580_v9 = vadd.f32 %v1076_v58, %v579_v8 }
 0x185   : > { %v593_v12 = vmax.f32 %v580_v9, 0.0 }
 0x18a   : > { %v581_v10 = vpop.f32.mrf.mxu1 }
 0x18b   : > { %v582_v11 = vadd.f32 %v1076_v58, %v581_v10 }
 0x18d   : > { %v594_v13 = vmax.f32 %v582_v11, 0.0 }
 0x18f   : > { %v599_v14 = vpack.c.bf16 %v594_v13, %v593_v12 }
 0x191   : > { %687 = vmatmul.bf16.gmra.mxu2 %v599_v14 }
 0x192   : > { %v584_v15 = vpop.f32.mrf.mxu1 }
 0x193   : > { %v585_v16 = vadd.f32 %v1076_v58, %v584_v15 }
 0x195   : > { %v595_v19 = vmax.f32 %v585_v16, 0.0 }
 0x19a   : > { %v586_v17 = vpop.f32.mrf.mxu1 }
 0x19b   : > { %v587_v18 = vadd.f32 %v1076_v58, %v586_v17 }
 0x19d   : > { %v596_v20 = vmax.f32 %v587_v18, 0.0 }
 0x19f   : > { %v600_v21 = vpack.c.bf16 %v596_v20, %v595_v19 }
 0x1a1   : > { %692 = vmatmul.bf16.gmra.mxu2 %v600_v21 }
 0x1f4   : > { %v678_v23 = vpop.f32.mrf.mxu2 }
 0x1f5   : > { %v679_v24 = vadd.f32 %v1077_v22, %v678_v23 }
 0x1f7   : > { %698 = vst [vmem:[%s348_s29] sm:$0xff] %v679_v24 }
 0x1fc   : > { %v680_v25 = vpop.f32.mrf.mxu2 }
 0x1fd   : > { %v681_v26 = vadd.f32 %v1077_v22, %v680_v25 }
 0x1ff   : > { %699 = vst [vmem:[%s348_s29 + $0x8] sm:$0xff] %v681_v26 }
 0x204   : > { %v683_v27 = vpop.f32.mrf.mxu2 }
 0x205   : > { %v684_v28 = vadd.f32 %v1077_v22, %v683_v27 }
 0x207   : > { %700 = vst [vmem:[%s348_s29 + $0x10] sm:$0xff] %v684_v28 }
 0x20c   : > { %v685_v29 = vpop.f32.mrf.mxu2 }
 0x20d   : > { %v686_v30 = vadd.f32 %v1077_v22, %v685_v29 }
 0x20f   : > { %701 = vst [vmem:[%s348_s29 + $0x18] sm:$0xff] %v686_v30 }
 0x214   : > { %v688_v31 = vpop.f32.mrf.mxu2 }
 0x215   : > { %v689_v32 = vadd.f32 %v1077_v22, %v688_v31 }
 0x217   : > { %702 = vst [vmem:[%s348_s29 + $0x20] sm:$0xff] %v689_v32 }
 0x21c   : > { %v690_v33 = vpop.f32.mrf.mxu2 }
 0x21d   : > { %v691_v34 = vadd.f32 %v1077_v22, %v690_v33 }
 0x21f   : > { %703 = vst [vmem:[%s348_s29 + $0x28] sm:$0xff] %v691_v34 }
 0x224   : > { %v693_v35 = vpop.f32.mrf.mxu2 }
 0x225   : > { %v694_v36 = vadd.f32 %v1077_v22, %v693_v35 }
 0x227   : > { %704 = vst [vmem:[%s348_s29 + $0x30] sm:$0xff] %v694_v36 }
 0x22c   : > { %v695_v37 = vpop.f32.mrf.mxu2 }
 0x22d   : > { %v696_v38 = vadd.f32 %v1077_v22, %v695_v37 }
 0x22f   : > { %705 = vst [vmem:[%s348_s29 + $0x38] sm:$0xff] %v696_v38 }
 0x230   : > { %1225 = shalt.err (!%p1222_p10)
}
 0x231   : > { %s1279_s15 = smov 128   ;;  %s1280_s29 = smov 8  }
 0x232   : > { %1008 = dma.vmem_to_hbm [thread:$0]  (%p1411_p0), %s720_s1, 1024, %s722_s23, %s707_s30, %s1279_s15, %s1279_s15, %s1280_s29  }
 0x233 PF: > { %p1035_p11 = scmp.ge.s32.totalorder %s1272_s27, 2  ;;  %s736_s9 = sand.u32 1, %s1260_s24  }
 0x234   : > { %s737_s21 = scalar_lea.sflag [#allocation4], %s736_s9 }
 0x235   : > { %p1025_p12 = pnand %p1035_p11, %p1356_p6 }
 0x237   : > { %p1026_p13 = pneg %p1025_p12 }
 0x239   : > { %1255 = dma.done.wait (%p1026_p13), %s737_s21, 1024  }
 0x23a   : > { %1257 = vsyncadd (%p1026_p13), %s737_s21, 4294966272  ;;  %p22_p3 = scmp.ge.s32.totalorder %s1393_s13, 6   ;;  %s1525_s24 = smov %s1264_s25 }
 0x23b   : > { %s1526_s25 = smov %s1268_s26  ;;  %s1527_s26 = smov %s1407_s17 }
 0x23c   : > { %s1528_s27 = smov %s1393_s13  ;;  %24 = sbr.rel (!%p22_p3) target bundleno = 9 (0x9), region = 105 }
 0x241   :  { %743 = vsyncpa [#allocation3], 1 }
 0x242   :  { %745 = vsyncpa [#allocation3 + $0x1], 1 }
 0x243   :  { %746 = vsyncpa [#allocation6], 1 }
 0x244   :  { %747 = vsyncpa [#allocation9], 1 }
 0x245   :  { %748 = vsyncpa [#allocation4], 1 }
 0x246   :  { %750 = vsyncpa [#allocation4 + $0x1], 1 }

</bundles_post_ra>
